<compile_context>
chip_gen: v5e
topology: v5e:2x2
jax: 0.10.0
libtpu: 0.0.40
codegen_flags: <defaults>
</compile_context>

<pallas_src>
import functools
import math

import jax
import jax.numpy as jnp
from jax import lax
from jax.experimental import pallas as pl
from jax.experimental.pallas import tpu as pltpu

_LANES = 128         # TPU lane width
_BLOCK_ROWS = 4096   # 4096 x 128 x 4B = 2 MiB f32 per input block (safe on v5e/v6e/v7x)
_CHUNK_ROWS = 512    # in-kernel sub-chunk: 512 x 128 x 4B = 256 KiB per temporary


def _round_up(x, m):
    return ((x + m - 1) // m) * m


def _wbce_partial_kernel(x_ref, t_ref, out_ref, *,
                         weight, smooth, log_eps, log_1m_eps,
                         chunk_rows, n_chunks_full, n_chunks_last,
                         last_valid_rows, needs_mask):
    def block_sum(n_chunks, valid_rows):
        def body(c, acc):
            r0 = pl.multiple_of(c * chunk_rows, chunk_rows)
            x = x_ref[pl.ds(r0, chunk_rows), :].astype(jnp.float32)
            t = t_ref[pl.ds(r0, chunk_rows), :].astype(jnp.float32)

            # softplus(-x) = -log(sigmoid(x)); numerically stable.
            sp = jax.nn.softplus(-x)
            # Clipping the log terms == clipping p = sigmoid(x) to [eps, 1-eps]
            # before taking logs (log is monotone).
            log_p = jnp.clip(-sp, log_eps, log_1m_eps)          # log(clip(p))
            log_1mp = jnp.clip(-(sp + x), log_eps, log_1m_eps)  # log(clip(1-p))

            tc = jnp.clip(t, smooth, 1.0 - smooth)
            loss = -(weight * tc) * log_p - (1.0 - tc) * log_1mp

            if valid_rows is not None:
                # Only the (trace-time-known) partial last block masks; select
                # form discards any NaN/Inf living in Pallas edge-block padding.
                row = lax.broadcasted_iota(jnp.int32, loss.shape, 0) + r0
                loss = jnp.where(row < valid_rows, loss, 0.0)

            # Partial sum kept as a vreg-shaped (8,128) slab: pure VPU adds;
            # the cross-lane/sublane reduce is deferred to the wrapper.
            return acc + jnp.sum(loss.reshape(-1, 8, _LANES), axis=0)

        return lax.fori_loop(0, n_chunks, body,
                             jnp.zeros((8, _LANES), jnp.float32),
                             unroll=(n_chunks <= 4))

    if not needs_mask:
        # Every block (including the last) is full: no masking anywhere.
        out_ref[...] = block_sum(n_chunks_full, None)[None]
    else:
        is_last = pl.program_id(0) == pl.num_programs(0) - 1

        @pl.when(jnp.logical_not(is_last))
        def _():
            out_ref[...] = block_sum(n_chunks_full, None)[None]

        @pl.when(is_last)
        def _():
            out_ref[...] = block_sum(n_chunks_last, last_valid_rows)[None]


def wbce_with_logit_loss(output, target, *, weight=1.0, ignore_index=None,
                         reduction="mean", smooth=0.01, block_rows=_BLOCK_ROWS):
    """Pallas implementation of WBCEWithLogitLoss.forward."""
    assert output.shape[0] == target.shape[0], "batch size mismatch"
    # TODO(synk): ignore_index masking not implemented (module default is None).
    assert ignore_index is None
    # TODO(synk): reduction='none' (elementwise output) not kernelized.
    assert reduction in ("mean", "sum")

    eps = 1e-06
    weight = float(weight)
    smooth = float(smooth)
    log_eps = float(math.log(eps))
    log_1m_eps = float(math.log1p(-eps))

    total = int(output.size)
    x = output.reshape(-1)
    t = target.reshape(-1)

    def _loss_terms(xv, tv):
        xv = xv.astype(jnp.float32)
        tv = tv.astype(jnp.float32)
        sp = jax.nn.softplus(-xv)
        log_p = jnp.clip(-sp, log_eps, log_1m_eps)
        log_1mp = jnp.clip(-(sp + xv), log_eps, log_1m_eps)
        tv = jnp.clip(tv, smooth, 1.0 - smooth)
        return -(weight * tv) * log_p - (1.0 - tv) * log_1mp

    rows = total // _LANES
    main = rows * _LANES

    # <=127-element tail handled with plain jnp (no full-array pad copy).
    tail_sum = jnp.zeros((), jnp.float32)
    if main != total:
        tail_sum = jnp.sum(_loss_terms(x[main:], t[main:]))
        x = x[:main]
        t = t[:main]

    if rows == 0:
        loss_sum = tail_sum
    else:
        x2 = x.reshape(rows, _LANES)
        t2 = t.reshape(rows, _LANES)

        # Sub-chunk and block row counts (all static / trace-time).
        if rows >= _CHUNK_ROWS:
            chunk = _CHUNK_ROWS
        else:
            chunk = _round_up(rows, 8)
        br = min(block_rows, _round_up(rows, chunk))
        # Prefer >=2 roughly-even parallel blocks so both v7x TensorCores get
        # work (harmless no-op split on v5e/v6e).
        if rows > chunk and pl.cdiv(rows, br) < 2:
            br = _round_up(pl.cdiv(rows, 2), chunk)

        grid_g = pl.cdiv(rows, br)
        last_valid_rows = rows - (grid_g - 1) * br          # in (0, br]
        needs_mask = (last_valid_rows != br)
        n_chunks_full = br // chunk
        n_chunks_last = pl.cdiv(last_valid_rows, chunk)

        kernel = functools.partial(
            _wbce_partial_kernel,
            weight=weight, smooth=smooth,
            log_eps=log_eps, log_1m_eps=log_1m_eps,
            chunk_rows=chunk,
            n_chunks_full=n_chunks_full,
            n_chunks_last=n_chunks_last,
            last_valid_rows=last_valid_rows,
            needs_mask=needs_mask)

        in_bytes = x2.size * x2.dtype.itemsize + t2.size * t2.dtype.itemsize
        cost = pl.CostEstimate(
            flops=16 * main,
            transcendentals=2 * main,
            bytes_accessed=int(in_bytes + grid_g * 8 * _LANES * 4))

        partials = pl.pallas_call(
            kernel,
            out_shape=jax.ShapeDtypeStruct((grid_g, 8, _LANES), jnp.float32),
            grid_spec=pltpu.PrefetchScalarGridSpec(
                num_scalar_prefetch=0,
                grid=(grid_g,),
                in_specs=[
                    pl.BlockSpec((br, _LANES), lambda g: (g, 0)),
                    pl.BlockSpec((br, _LANES), lambda g: (g, 0)),
                ],
                out_specs=pl.BlockSpec((1, 8, _LANES), lambda g: (g, 0, 0)),
            ),
            compiler_params=pltpu.CompilerParams(
                dimension_semantics=("parallel",),   # no carried state
                vmem_limit_bytes=48 * 1024 * 1024),  # <= 64 MiB (v7x physical)
            cost_estimate=cost,
        )(x2, t2)

        loss_sum = jnp.sum(partials) + tail_sum

    if reduction == "mean":
        return loss_sum / jnp.float32(total)
    return loss_sum


def _reference(output, target, weight=1.0, smooth=0.01):
    """Faithful port of the torch forward (sigmoid -> clamp -> logs -> mean)."""
    n = output.shape[0]
    x = output.reshape(n, -1).astype(jnp.float32)
    t = target.reshape(n, -1).astype(jnp.float32)
    eps = 1e-06
    p = jnp.clip(jax.nn.sigmoid(x), eps, 1.0 - eps)
    t = jnp.clip(t, smooth, 1.0 - smooth)
    loss = -weight * t * jnp.log(p) - (1.0 - t) * jnp.log(1.0 - p)
    return jnp.mean(loss)


if __name__ == "__main__":
    key = jax.random.PRNGKey(0)
    k1, k2 = jax.random.split(key)

    # shapes per module doc: [N, 1, h, w] logits and same-shape targets
    N, C, H, W = 2, 1, 16, 16
    logits = jax.random.normal(k1, (N, C, H, W), dtype=jnp.float32)
    target = (jax.random.uniform(k2, (N, C, H, W)) > 0.5).astype(jnp.float32)

    loss = wbce_with_logit_loss(logits, target, weight=1.0, reduction="mean")
    loss = jax.block_until_ready(loss)

    ref = _reference(logits, target, weight=1.0)
    assert jnp.allclose(loss, ref, rtol=1e-5, atol=1e-6), (loss, ref)
    print("KERNEL_OK")
</pallas_src>

<mosaic_0001>
module attributes {stable_mosaic.version = 11 : i64} {
  func.func @_wbce_partial_kernel(%arg0: i32, %arg1: memref<8x128xf32, #tpu.memory_space<vmem>>, %arg2: memref<8x128xf32, #tpu.memory_space<vmem>>, %arg3: memref<1x8x128xf32, #tpu.memory_space<vmem>>) attributes {dimension_semantics = [#tpu.dimension_semantics<parallel>], iteration_bounds = array<i64: 1>, scalar_prefetch = 0 : i64, scratch_operands = 0 : i64, tpu.core_type = #tpu.core_type<tc>, window_params = [{transform_indices = @transform_0, window_bounds = array<i64: 8, 128>}, {transform_indices = @transform_1, window_bounds = array<i64: 8, 128>}, {transform_indices = @transform_2, window_bounds = array<i64: 1, 8, 128>}]} {
    %c0_i32 = arith.constant 0 : i32
    %0 = arith.cmpi eq, %arg0, %c0_i32 : i32
    %true = arith.constant true
    %1 = arith.xori %0, %true : i1
    %2 = arith.extui %1 : i1 to i32
    %c0_i32_0 = arith.constant 0 : i32
    %3 = arith.cmpi ne, %2, %c0_i32_0 : i32
    scf.if %3 {
      %cst = arith.constant 0.000000e+00 : f32
      %6 = vector.broadcast %cst : f32 to vector<8x128xf32>
      %c0_i32_2 = arith.constant 0 : i32
      %c8_i32 = arith.constant 8 : i32
      %7 = arith.muli %c0_i32_2, %c8_i32 : i32
      %8 = tpu.assume_multiple %7, 8 : i32
      %9 = arith.index_cast %8 : i32 to index
      %c0 = arith.constant 0 : index
      %10 = vector.load %arg1[%9, %c0] : memref<8x128xf32, #tpu.memory_space<vmem>>, vector<8x128xf32>
      %11 = arith.index_cast %8 : i32 to index
      %c0_3 = arith.constant 0 : index
      %12 = vector.load %arg2[%11, %c0_3] : memref<8x128xf32, #tpu.memory_space<vmem>>, vector<8x128xf32>
      %cst_4 = arith.constant 0.000000e+00 : f32
      %13 = vector.broadcast %cst_4 : f32 to vector<8x128xf32>
      %14 = arith.subf %13, %10 : vector<8x128xf32>
      %cst_5 = arith.constant 0.000000e+00 : f32
      %15 = vector.broadcast %cst_5 : f32 to vector<8x128xf32>
      %16 = arith.maximumf %14, %15 : vector<8x128xf32>
      %17 = vector.broadcast %cst_5 : f32 to vector<8x128xf32>
      %18 = arith.subf %14, %17 : vector<8x128xf32>
      %19 = arith.cmpf one, %18, %18 : vector<8x128xf32>
      %20 = vector.broadcast %cst_5 : f32 to vector<8x128xf32>
      %21 = arith.addf %14, %20 : vector<8x128xf32>
      %22 = math.absf %18 : vector<8x128xf32>
      %cst_6 = arith.constant 0.000000e+00 : f32
      %23 = vector.broadcast %cst_6 : f32 to vector<8x128xf32>
      %24 = arith.subf %23, %22 : vector<8x128xf32>
      %25 = math.exp %24 : vector<8x128xf32>
      %26 = math.log1p %25 : vector<8x128xf32>
      %27 = arith.addf %16, %26 : vector<8x128xf32>
      %28 = arith.select %19, %21, %27 : vector<8x128xi1>, vector<8x128xf32>
      %cst_7 = arith.constant 0.000000e+00 : f32
      %29 = vector.broadcast %cst_7 : f32 to vector<8x128xf32>
      %30 = arith.subf %29, %28 : vector<8x128xf32>
      %cst_8 = arith.constant -13.8155107 : f32
      %cst_9 = arith.constant -1.00000045E-6 : f32
      %31 = vector.broadcast %cst_8 : f32 to vector<8x128xf32>
      %32 = arith.maximumf %31, %30 : vector<8x128xf32>
      %33 = vector.broadcast %cst_9 : f32 to vector<8x128xf32>
      %34 = arith.minimumf %33, %32 : vector<8x128xf32>
      %35 = arith.addf %28, %10 : vector<8x128xf32>
      %cst_10 = arith.constant 0.000000e+00 : f32
      %36 = vector.broadcast %cst_10 : f32 to vector<8x128xf32>
      %37 = arith.subf %36, %35 : vector<8x128xf32>
      %cst_11 = arith.constant -13.8155107 : f32
      %cst_12 = arith.constant -1.00000045E-6 : f32
      %38 = vector.broadcast %cst_11 : f32 to vector<8x128xf32>
      %39 = arith.maximumf %38, %37 : vector<8x128xf32>
      %40 = vector.broadcast %cst_12 : f32 to vector<8x128xf32>
      %41 = arith.minimumf %40, %39 : vector<8x128xf32>
      %cst_13 = arith.constant 0.00999999977 : f32
      %cst_14 = arith.constant 9.900000e-01 : f32
      %42 = vector.broadcast %cst_13 : f32 to vector<8x128xf32>
      %43 = arith.maximumf %42, %12 : vector<8x128xf32>
      %44 = vector.broadcast %cst_14 : f32 to vector<8x128xf32>
      %45 = arith.minimumf %44, %43 : vector<8x128xf32>
      %cst_15 = arith.constant 1.000000e+00 : f32
      %46 = vector.broadcast %cst_15 : f32 to vector<8x128xf32>
      %47 = arith.mulf %46, %45 : vector<8x128xf32>
      %cst_16 = arith.constant 0.000000e+00 : f32
      %48 = vector.broadcast %cst_16 : f32 to vector<8x128xf32>
      %49 = arith.subf %48, %47 : vector<8x128xf32>
      %50 = arith.mulf %49, %34 : vector<8x128xf32>
      %cst_17 = arith.constant 1.000000e+00 : f32
      %51 = vector.broadcast %cst_17 : f32 to vector<8x128xf32>
      %52 = arith.subf %51, %45 : vector<8x128xf32>
      %53 = arith.mulf %52, %41 : vector<8x128xf32>
      %54 = arith.subf %50, %53 : vector<8x128xf32>
      %55 = vector.shape_cast %54 : vector<8x128xf32> to vector<1x8x128xf32>
      %cst_18 = arith.constant dense<0.000000e+00> : vector<8x128xf32>
      %56 = vector.multi_reduction <add>, %55, %cst_18 [0] : vector<1x8x128xf32> to vector<8x128xf32>
      %57 = arith.addf %6, %56 : vector<8x128xf32>
      %c1_i32 = arith.constant 1 : i32
      %58 = vector.shape_cast %57 : vector<8x128xf32> to vector<1x8x128xf32>
      %c0_19 = arith.constant 0 : index
      %c0_20 = arith.constant 0 : index
      %c0_21 = arith.constant 0 : index
      %59 = vector.load %arg3[%c0_19, %c0_20, %c0_21] : memref<1x8x128xf32, #tpu.memory_space<vmem>>, vector<1x8x128xf32>
      tpu.vector_store %arg3[%c0_19, %c0_20, %c0_21], %58 {strides = array<i32>} : memref<1x8x128xf32, #tpu.memory_space<vmem>>, vector<1x8x128xf32>,
    } else {
    }
    %4 = arith.extui %0 : i1 to i32
    %c0_i32_1 = arith.constant 0 : i32
    %5 = arith.cmpi ne, %4, %c0_i32_1 : i32
    scf.if %5 {
      %cst = arith.constant 0.000000e+00 : f32
      %6 = vector.broadcast %cst : f32 to vector<8x128xf32>
      %c0_i32_2 = arith.constant 0 : i32
      %c8_i32 = arith.constant 8 : i32
      %7 = arith.muli %c0_i32_2, %c8_i32 : i32
      %8 = tpu.assume_multiple %7, 8 : i32
      %9 = arith.index_cast %8 : i32 to index
      %c0 = arith.constant 0 : index
      %10 = vector.load %arg1[%9, %c0] : memref<8x128xf32, #tpu.memory_space<vmem>>, vector<8x128xf32>
      %11 = arith.index_cast %8 : i32 to index
      %c0_3 = arith.constant 0 : index
      %12 = vector.load %arg2[%11, %c0_3] : memref<8x128xf32, #tpu.memory_space<vmem>>, vector<8x128xf32>
      %cst_4 = arith.constant 0.000000e+00 : f32
      %13 = vector.broadcast %cst_4 : f32 to vector<8x128xf32>
      %14 = arith.subf %13, %10 : vector<8x128xf32>
      %cst_5 = arith.constant 0.000000e+00 : f32
      %15 = vector.broadcast %cst_5 : f32 to vector<8x128xf32>
      %16 = arith.maximumf %14, %15 : vector<8x128xf32>
      %17 = vector.broadcast %cst_5 : f32 to vector<8x128xf32>
      %18 = arith.subf %14, %17 : vector<8x128xf32>
      %19 = arith.cmpf one, %18, %18 : vector<8x128xf32>
      %20 = vector.broadcast %cst_5 : f32 to vector<8x128xf32>
      %21 = arith.addf %14, %20 : vector<8x128xf32>
      %22 = math.absf %18 : vector<8x128xf32>
      %cst_6 = arith.constant 0.000000e+00 : f32
      %23 = vector.broadcast %cst_6 : f32 to vector<8x128xf32>
      %24 = arith.subf %23, %22 : vector<8x128xf32>
      %25 = math.exp %24 : vector<8x128xf32>
      %26 = math.log1p %25 : vector<8x128xf32>
      %27 = arith.addf %16, %26 : vector<8x128xf32>
      %28 = arith.select %19, %21, %27 : vector<8x128xi1>, vector<8x128xf32>
      %cst_7 = arith.constant 0.000000e+00 : f32
      %29 = vector.broadcast %cst_7 : f32 to vector<8x128xf32>
      %30 = arith.subf %29, %28 : vector<8x128xf32>
      %cst_8 = arith.constant -13.8155107 : f32
      %cst_9 = arith.constant -1.00000045E-6 : f32
      %31 = vector.broadcast %cst_8 : f32 to vector<8x128xf32>
      %32 = arith.maximumf %31, %30 : vector<8x128xf32>
      %33 = vector.broadcast %cst_9 : f32 to vector<8x128xf32>
      %34 = arith.minimumf %33, %32 : vector<8x128xf32>
      %35 = arith.addf %28, %10 : vector<8x128xf32>
      %cst_10 = arith.constant 0.000000e+00 : f32
      %36 = vector.broadcast %cst_10 : f32 to vector<8x128xf32>
      %37 = arith.subf %36, %35 : vector<8x128xf32>
      %cst_11 = arith.constant -13.8155107 : f32
      %cst_12 = arith.constant -1.00000045E-6 : f32
      %38 = vector.broadcast %cst_11 : f32 to vector<8x128xf32>
      %39 = arith.maximumf %38, %37 : vector<8x128xf32>
      %40 = vector.broadcast %cst_12 : f32 to vector<8x128xf32>
      %41 = arith.minimumf %40, %39 : vector<8x128xf32>
      %cst_13 = arith.constant 0.00999999977 : f32
      %cst_14 = arith.constant 9.900000e-01 : f32
      %42 = vector.broadcast %cst_13 : f32 to vector<8x128xf32>
      %43 = arith.maximumf %42, %12 : vector<8x128xf32>
      %44 = vector.broadcast %cst_14 : f32 to vector<8x128xf32>
      %45 = arith.minimumf %44, %43 : vector<8x128xf32>
      %cst_15 = arith.constant 1.000000e+00 : f32
      %46 = vector.broadcast %cst_15 : f32 to vector<8x128xf32>
      %47 = arith.mulf %46, %45 : vector<8x128xf32>
      %cst_16 = arith.constant 0.000000e+00 : f32
      %48 = vector.broadcast %cst_16 : f32 to vector<8x128xf32>
      %49 = arith.subf %48, %47 : vector<8x128xf32>
      %50 = arith.mulf %49, %34 : vector<8x128xf32>
      %cst_17 = arith.constant 1.000000e+00 : f32
      %51 = vector.broadcast %cst_17 : f32 to vector<8x128xf32>
      %52 = arith.subf %51, %45 : vector<8x128xf32>
      %53 = arith.mulf %52, %41 : vector<8x128xf32>
      %54 = arith.subf %50, %53 : vector<8x128xf32>
      %55 = tpu.iota {dimensions = array<i32: 0>} : vector<8x128xi32>
      %56 = vector.broadcast %8 : i32 to vector<8x128xi32>
      %57 = arith.addi %55, %56 : vector<8x128xi32>
      %c4_i32 = arith.constant 4 : i32
      %58 = vector.broadcast %c4_i32 : i32 to vector<8x128xi32>
      %59 = arith.cmpi slt, %57, %58 : vector<8x128xi32>
      %cst_18 = arith.constant 0.000000e+00 : f32
      %60 = vector.broadcast %cst_18 : f32 to vector<8x128xf32>
      %61 = arith.select %59, %54, %60 : vector<8x128xi1>, vector<8x128xf32>
      %62 = vector.shape_cast %61 : vector<8x128xf32> to vector<1x8x128xf32>
      %cst_19 = arith.constant dense<0.000000e+00> : vector<8x128xf32>
      %63 = vector.multi_reduction <add>, %62, %cst_19 [0] : vector<1x8x128xf32> to vector<8x128xf32>
      %64 = arith.addf %6, %63 : vector<8x128xf32>
      %c1_i32 = arith.constant 1 : i32
      %65 = vector.shape_cast %64 : vector<8x128xf32> to vector<1x8x128xf32>
      %c0_20 = arith.constant 0 : index
      %c0_21 = arith.constant 0 : index
      %c0_22 = arith.constant 0 : index
      %66 = vector.load %arg3[%c0_20, %c0_21, %c0_22] : memref<1x8x128xf32, #tpu.memory_space<vmem>>, vector<1x8x128xf32>
      tpu.vector_store %arg3[%c0_20, %c0_21, %c0_22], %65 {strides = array<i32>} : memref<1x8x128xf32, #tpu.memory_space<vmem>>, vector<1x8x128xf32>,
    } else {
    }
    return
  }
  func.func @transform_0(%arg0: i32) -> (i32, i32) {
    %c0_i32 = arith.constant 0 : i32
    %c0_i32_0 = arith.constant 0 : i32
    return %arg0, %c0_i32 : i32, i32
  }
  func.func @transform_1(%arg0: i32) -> (i32, i32) {
    %c0_i32 = arith.constant 0 : i32
    %c0_i32_0 = arith.constant 0 : i32
    return %arg0, %c0_i32 : i32, i32
  }
  func.func @transform_2(%arg0: i32) -> (i32, i32, i32) {
    %c0_i32 = arith.constant 0 : i32
    %c0_i32_0 = arith.constant 0 : i32
    %c0_i32_1 = arith.constant 0 : i32
    return %arg0, %c0_i32, %c0_i32_0 : i32, i32, i32
  }
}

</mosaic_0001>

<bundles_post_ra>
// kernel: tpu_custom_call.1
= control target key start
LH: loop header
LB: loop body
LE: loop exit
PB: predicated region body
PF: predicated region fallthrough
CT: control target
= control target key end

     0   :  { %7 = vsyncpa [#allocation3], 0  ;;  %s268_s0 = inlined_call_operand.hbm [shape: f32[4,128], index: 0, kind: input, shape index: {}]   ;;  %s269_s1 = inlined_call_operand.hbm [shape: f32[4,128], index: 1, kind: input, shape index: {}]   ;;  %s270_s2 = inlined_call_operand.hbm [shape: f32[1,8,128], index: 2, kind: output, shape index: {}]  }
   0x1   :  { %8 = vsyncpa [#allocation6], 0 }
   0x2   :  { %9 = vsyncpa [#allocation4], 0 }
   0x3   :  { %13 = vsyncadd [#allocation3], 64  ;;  %s14_s11 = sshll.u32 %s268_s0, 4  ;;  %s239_s12 = smov [#allocation2]   ;;  %s15_s11 = int_to_ptr.hbm [resolvable:$true] %s14_s11 }
   0x4   :  { %s16_s13 = sshll.u32 %s239_s12, 4  ;;  %s240_s14 = smov 64   ;;  %s17_s13 = int_to_ptr.vmem [resolvable:$true] %s16_s13 }
   0x5   :  { %s241_s15 = smov 4  }
   0x6   :  { %22 = dma.hbm_to_vmem [thread:$0]  %s15_s11, 64, %s17_s13, [#allocation3], %s240_s14, %s240_s14, %s241_s15  }
   0x7   :  { %26 = vsyncadd [#allocation6], 64  ;;  %s27_s18 = sshll.u32 %s269_s1, 4  ;;  %s242_s19 = smov [#allocation5]   ;;  %s28_s18 = int_to_ptr.hbm [resolvable:$true] %s27_s18 }
   0x8   :  { %s29_s20 = sshll.u32 %s242_s19, 4  ;;  %s30_s20 = int_to_ptr.vmem [resolvable:$true] %s29_s20 }
   0x9   :  { %35 = dma.hbm_to_vmem [thread:$0]  %s28_s18, 64, %s30_s20, [#allocation6], %s240_s14, %s240_s14, %s241_s15  }
   0xa   :  { %233 = dma.done.wait [#allocation3], 128  }
   0xb   :  { %234 = vsyncadd [#allocation3], 4294967168 }
   0xc   :  { %235 = dma.done.wait [#allocation6], 128  }
   0xd   :  { %236 = vsyncadd [#allocation6], 4294967168  ;;  %v90_v0 = vld [vmem:[#allocation2] sm:$0xff]  ;;  %v91_v10 = vld [vmem:[#allocation5] sm:$0xff]  ;;  %v125_v22 = vlaneseq  ;;  %s243_s0 = smov [#allocation7]   ;;  %s141_s23 = sshll.u32 %s270_s2, 4  ;;  %s142_s23 = int_to_ptr.hbm [resolvable:$true] %s141_s23 }
   0xe   :  { %v92_v1 = vsub.f32 0.0, %v90_v0  ;;  %v118_v15 = vmax.f32 %v91_v10, 0.01  ;;  %s139_s1 = sshll.u32 %s243_s0, 4  ;;  %s140_s1 = int_to_ptr.vmem [resolvable:$true] %s139_s1 }
   0xf   :  { %v126_v29 = vshrl.u32 %v125_v22, 7 }
  0x10   :  { %v96_v2 = vand.u32 2147483647, %v92_v1  ;;  %v93_v13 = vmax.f32 %v92_v1, 0.0  ;;  %vm94_vm1 = vcmp.ne.f32.partialorder %v92_v1, %v92_v1  ;;  %v119_v18 = vmin.f32 %v118_v15, 0.99 }
  0x11   :  { %vm129_vm2 = vcmp.lt.s32.totalorder %v126_v29, 4 }
  0x12   :  { %v97_v3 = vsub.f32 0.0, %v96_v2  ;;  %v120_v25 = vsub.f32 0.0, %v119_v18  ;;  %v122_v28 = vsub.f32 1.0, %v119_v18 }
  0x14   :  { %v98_v4 = vmul.f32 1.442695, %v97_v3 }
  0x16   :  { %157 = vpow2.f32 %v98_v4 }
  0x1c   :  { %v158_v5 = vpop.eup %157 }
  0x1d   :  { %v100_v6 = vadd.f32 1.0, %v158_v5  ;;  %v103_v7 = vmul.f32 -0.5, %v158_v5  ;;  %v106_v9 = vand.u32 2147483647, %v158_v5 }
  0x1f   :  { %159 = vlog2.f32 %v100_v6  ;;  %v104_v8 = vadd.f32 1.0, %v103_v7  ;;  %vm107_vm0 = vcmp.lt.f32.partialorder %v106_v9, 0.0004427343 }
  0x21   :  { %v105_v11 = vmul.f32 %v158_v5, %v104_v8 }
  0x25   :  { %v160_v12 = vpop.eup %159 }
  0x26   :  { %v102_v14 = vmul.f32 0.6931472, %v160_v12 }
  0x28   :  { %v108_v16 = vsel %vm107_vm0, %v105_v11, %v102_v14 }
  0x29   :  { %v109_v17 = vadd.f32 %v108_v16, %v93_v13 }
  0x2b   :  { %v110_v19 = vsel %vm94_vm1, %v92_v1, %v109_v17 }
  0x2c   :  { %v111_v20 = vsub.f32 0.0, %v110_v19  ;;  %v114_v21 = vadd.f32 %v110_v19, %v90_v0 }
  0x2e   :  { %v112_v23 = vmax.f32 %v111_v20, -13.815511  ;;  %v115_v24 = vsub.f32 0.0, %v114_v21 }
  0x30   :  { %v113_v26 = vmin.f32 %v112_v23, -1.0000005e-06  ;;  %v116_v27 = vmax.f32 %v115_v24, -13.815511 }
  0x32   :  { %v117_v30 = vmin.f32 %v116_v27, -1.0000005e-06  ;;  %v121_v31 = vmul.f32 %v120_v25, %v113_v26 }
  0x34   :  { %v123_v32 = vmul.f32 %v122_v28, %v117_v30 }
  0x36   :  { %v124_v33 = vsub.f32 %v121_v31, %v123_v32 }
  0x38   :  { %v130_v34 = vsel %vm129_vm2, %v124_v33, 0.0 }
  0x39   :  { %133 = vst [vmem:[#allocation7] sm:$0xff] %v130_v34 }
  0x3a   :  { %144 = dma.vmem_to_hbm [thread:$0]  %s140_s1, 128, %s142_s23, [#allocation4]  }
  0x3b   :  { %237 = dma.done.wait [#allocation4], 128  }
  0x3c   :  { %238 = vsyncadd [#allocation4], 4294967168 }
  0x3d   :  { %149 = vsyncpa [#allocation3], 1 }
  0x3e   :  { %150 = vsyncpa [#allocation6], 1 }
  0x3f   :  { %151 = vsyncpa [#allocation4], 1 }

</bundles_post_ra>
